<compile_context>
chip_gen: v5e
topology: v5e:2x2
jax: 0.10.0
libtpu: 0.0.40
codegen_flags: <defaults>
</compile_context>

<pallas_src>
import jax
import jax.numpy as jnp
from jax.experimental import pallas as pl
from jax.experimental.pallas import tpu as pltpu


def policy_kernel(x_ref, p1_ref, p2_ref, out_ref):
    # x_ref  : (1, B, 4)   one timestep's state group
    # p1_ref : (5, 128)    rows 0..3 = w1[k, :], row 4 = b1
    # p2_ref : (3, 128)    rows 0..1 = w2^T,     row 2[:2] = b2
    # out_ref: (1, B, 2)
    x = x_ref[0]          # (B, 4)
    p1 = p1_ref[...]      # (5, 128)
    p2 = p2_ref[...]      # (3, 128)

    # ---- fc1 + ReLU: 4 VPU broadcast-MACs (K=4), bias row folded in -------------
    h = p1[4:5, :] + x[:, 0:1] * p1[0:1, :]          # (B, 128)
    for k in range(1, 4):                            # unrolled at trace time
        h = h + x[:, k:k + 1] * p1[k:k + 1, :]
    h = jnp.maximum(h, 0.0)

    # ---- fc2: two broadcast-multiplies + lane reductions (no MXU, no lane pad) --
    c0 = jnp.sum(h * p2[0:1, :], axis=-1, keepdims=True)   # (B, 1)
    c1 = jnp.sum(h * p2[1:2, :], axis=-1, keepdims=True)   # (B, 1)
    logits = jnp.concatenate([c0, c1], axis=-1) + p2[2:3, 0:2]   # (B, 2)

    # ---- softmax over dim=0 (batch axis of this group), matching F.softmax(., 0)
    m = jnp.max(logits, axis=0, keepdims=True)
    e = jnp.exp(logits - m)
    denom = jnp.sum(e, axis=0, keepdims=True)
    out_ref[0] = (e / denom).astype(out_ref.dtype)   # exact divide keeps 1e-5 tol


def policy_forward(x, p1, p2):
    """x: (T, B, 4) stack of independent state groups, or a single (B, 4) group.

    Each (B, 4) group gets its own dim=0 softmax, i.e. identical to calling the
    torch module T times — but in one pallas_call so fixed overhead is amortized
    and the packed weights are DMA'd into VMEM only once.
    """
    squeeze = x.ndim == 2
    if squeeze:
        x = x[None]
    T, B, _ = x.shape

    out = pl.pallas_call(
        policy_kernel,
        out_shape=jax.ShapeDtypeStruct((T, B, 2), jnp.float32),
        grid=(T,),
        in_specs=[
            pl.BlockSpec((1, B, 4), lambda t: (t, 0, 0)),
            pl.BlockSpec((5, 128), lambda t: (0, 0)),   # constant index -> resident
            pl.BlockSpec((3, 128), lambda t: (0, 0)),   # constant index -> resident
        ],
        out_specs=pl.BlockSpec((1, B, 2), lambda t: (t, 0, 0)),
        compiler_params=pltpu.CompilerParams(
            dimension_semantics=("parallel",)),          # use both TCs on v7x
    )(x, p1, p2)
    return out[0] if squeeze else out


def init_params(key):
    """Deterministic init mimicking torch.nn.Linear (uniform(-1/sqrt(fan_in), +))."""
    k1, k2, k3, k4 = jax.random.split(key, 4)
    bound1 = 1.0 / jnp.sqrt(4.0)
    bound2 = 1.0 / jnp.sqrt(128.0)
    # stored as [in, out] (transposed vs. torch's [out, in]) so math is x @ W
    w1 = jax.random.uniform(k1, (4, 128), jnp.float32, -bound1, bound1)
    b1 = jax.random.uniform(k2, (128,), jnp.float32, -bound1, bound1)
    w2 = jax.random.uniform(k3, (128, 2), jnp.float32, -bound2, bound2)
    b2 = jax.random.uniform(k4, (2,), jnp.float32, -bound2, bound2)
    return w1, b1, w2, b2


def pack_params(w1, b1, w2, b2):
    """Pack into two lane-dense (.,128) slabs for minimal DMA / VMEM padding."""
    p1 = jnp.concatenate([w1, b1.reshape(1, 128)], axis=0)          # (5, 128)
    b2_row = jnp.zeros((1, 128), jnp.float32).at[0, :2].set(b2)
    p2 = jnp.concatenate([w2.T, b2_row], axis=0)                    # (3, 128)
    return p1, p2


def reference_forward(x, w1, b1, w2, b2):
    h = jax.nn.relu(x @ w1 + b1)
    logits = h @ w2 + b2
    # softmax over dim=0 of each (B, 2) group (axis=-2 handles both 2-D and 3-D x)
    return jax.nn.softmax(logits, axis=-2)


if __name__ == "__main__":
    key = jax.random.PRNGKey(0)
    kx, kp = jax.random.split(key)

    T, B = 8, 2     # 8 independent timesteps, each a (2, 4) state group
    x = jax.random.normal(kx, (T, B, 4), jnp.float32)
    w1, b1, w2, b2 = init_params(kp)
    p1, p2 = pack_params(w1, b1, w2, b2)

    # Batched-over-timesteps path (amortized overhead).
    out = policy_forward(x, p1, p2)
    out = jax.block_until_ready(out)
    ref = reference_forward(x, w1, b1, w2, b2)
    assert out.shape == (T, B, 2)
    assert jnp.allclose(out, ref, atol=1e-5, rtol=1e-5), (out, ref)

    # Single-group path (exactly one torch forward() on a (B, 4) input).
    out1 = policy_forward(x[0], p1, p2)
    out1 = jax.block_until_ready(out1)
    ref1 = reference_forward(x[0], w1, b1, w2, b2)
    assert out1.shape == (B, 2)
    assert jnp.allclose(out1, ref1, atol=1e-5, rtol=1e-5), (out1, ref1)

    print("KERNEL_OK")
</pallas_src>

<mosaic_0001>
module attributes {stable_mosaic.version = 11 : i64} {
  func.func @policy_kernel(%arg0: i32, %arg1: memref<1x2x4xf32, #tpu.memory_space<vmem>>, %arg2: memref<5x128xf32, #tpu.memory_space<vmem>>, %arg3: memref<3x128xf32, #tpu.memory_space<vmem>>, %arg4: memref<1x2x2xf32, #tpu.memory_space<vmem>>) attributes {dimension_semantics = [#tpu.dimension_semantics<parallel>], iteration_bounds = array<i64: 8>, scalar_prefetch = 0 : i64, scratch_operands = 0 : i64, tpu.core_type = #tpu.core_type<tc>, window_params = [{transform_indices = @transform_0, window_bounds = array<i64: 1, 2, 4>}, {pipeline_mode = #tpu.pipeline_mode<synchronous>, transform_indices = @transform_1, window_bounds = array<i64: 5, 128>}, {pipeline_mode = #tpu.pipeline_mode<synchronous>, transform_indices = @transform_2, window_bounds = array<i64: 3, 128>}, {transform_indices = @transform_3, window_bounds = array<i64: 1, 2, 2>}]} {
    %c0 = arith.constant 0 : index
    %c0_0 = arith.constant 0 : index
    %c0_1 = arith.constant 0 : index
    %0 = vector.load %arg1[%c0, %c0_0, %c0_1] : memref<1x2x4xf32, #tpu.memory_space<vmem>>, vector<1x2x4xf32>
    %1 = vector.shape_cast %0 : vector<1x2x4xf32> to vector<2x4xf32>
    %c0_2 = arith.constant 0 : index
    %c0_3 = arith.constant 0 : index
    %2 = vector.load %arg2[%c0_2, %c0_3] : memref<5x128xf32, #tpu.memory_space<vmem>>, vector<5x128xf32>
    %c0_4 = arith.constant 0 : index
    %c0_5 = arith.constant 0 : index
    %3 = vector.load %arg3[%c0_4, %c0_5] : memref<3x128xf32, #tpu.memory_space<vmem>>, vector<3x128xf32>
    %4 = vector.extract_strided_slice %2 {offsets = [4, 0], sizes = [1, 128], strides = [1, 1]} : vector<5x128xf32> to vector<1x128xf32>
    %5 = vector.extract_strided_slice %1 {offsets = [0, 0], sizes = [2, 1], strides = [1, 1]} : vector<2x4xf32> to vector<2x1xf32>
    %6 = vector.extract_strided_slice %2 {offsets = [0, 0], sizes = [1, 128], strides = [1, 1]} : vector<5x128xf32> to vector<1x128xf32>
    %7 = vector.broadcast %5 : vector<2x1xf32> to vector<2x128xf32>
    %8 = vector.broadcast %6 : vector<1x128xf32> to vector<2x128xf32>
    %9 = arith.mulf %7, %8 : vector<2x128xf32>
    %10 = vector.broadcast %4 : vector<1x128xf32> to vector<2x128xf32>
    %11 = arith.addf %10, %9 : vector<2x128xf32>
    %12 = vector.extract_strided_slice %1 {offsets = [0, 1], sizes = [2, 1], strides = [1, 1]} : vector<2x4xf32> to vector<2x1xf32>
    %13 = vector.extract_strided_slice %2 {offsets = [1, 0], sizes = [1, 128], strides = [1, 1]} : vector<5x128xf32> to vector<1x128xf32>
    %14 = vector.broadcast %12 : vector<2x1xf32> to vector<2x128xf32>
    %15 = vector.broadcast %13 : vector<1x128xf32> to vector<2x128xf32>
    %16 = arith.mulf %14, %15 : vector<2x128xf32>
    %17 = arith.addf %11, %16 : vector<2x128xf32>
    %18 = vector.extract_strided_slice %1 {offsets = [0, 2], sizes = [2, 1], strides = [1, 1]} : vector<2x4xf32> to vector<2x1xf32>
    %19 = vector.extract_strided_slice %2 {offsets = [2, 0], sizes = [1, 128], strides = [1, 1]} : vector<5x128xf32> to vector<1x128xf32>
    %20 = vector.broadcast %18 : vector<2x1xf32> to vector<2x128xf32>
    %21 = vector.broadcast %19 : vector<1x128xf32> to vector<2x128xf32>
    %22 = arith.mulf %20, %21 : vector<2x128xf32>
    %23 = arith.addf %17, %22 : vector<2x128xf32>
    %24 = vector.extract_strided_slice %1 {offsets = [0, 3], sizes = [2, 1], strides = [1, 1]} : vector<2x4xf32> to vector<2x1xf32>
    %25 = vector.extract_strided_slice %2 {offsets = [3, 0], sizes = [1, 128], strides = [1, 1]} : vector<5x128xf32> to vector<1x128xf32>
    %26 = vector.broadcast %24 : vector<2x1xf32> to vector<2x128xf32>
    %27 = vector.broadcast %25 : vector<1x128xf32> to vector<2x128xf32>
    %28 = arith.mulf %26, %27 : vector<2x128xf32>
    %29 = arith.addf %23, %28 : vector<2x128xf32>
    %cst = arith.constant 0.000000e+00 : f32
    %30 = vector.broadcast %cst : f32 to vector<2x128xf32>
    %31 = arith.maximumf %29, %30 : vector<2x128xf32>
    %32 = vector.extract_strided_slice %3 {offsets = [0, 0], sizes = [1, 128], strides = [1, 1]} : vector<3x128xf32> to vector<1x128xf32>
    %33 = vector.broadcast %32 : vector<1x128xf32> to vector<2x128xf32>
    %34 = arith.mulf %31, %33 : vector<2x128xf32>
    %cst_6 = arith.constant dense<0.000000e+00> : vector<2xf32>
    %35 = vector.multi_reduction <add>, %34, %cst_6 [1] : vector<2x128xf32> to vector<2xf32>
    %36 = vector.shape_cast %35 : vector<2xf32> to vector<2x1xf32>
    %37 = vector.extract_strided_slice %3 {offsets = [1, 0], sizes = [1, 128], strides = [1, 1]} : vector<3x128xf32> to vector<1x128xf32>
    %38 = vector.broadcast %37 : vector<1x128xf32> to vector<2x128xf32>
    %39 = arith.mulf %31, %38 : vector<2x128xf32>
    %cst_7 = arith.constant dense<0.000000e+00> : vector<2xf32>
    %40 = vector.multi_reduction <add>, %39, %cst_7 [1] : vector<2x128xf32> to vector<2xf32>
    %41 = vector.shape_cast %40 : vector<2xf32> to vector<2x1xf32>
    %42 = tpu.concatenate %36, %41 in 1 : vector<2x1xf32>, vector<2x1xf32> -> vector<2x2xf32>
    %43 = vector.extract_strided_slice %3 {offsets = [2, 0], sizes = [1, 2], strides = [1, 1]} : vector<3x128xf32> to vector<1x2xf32>
    %44 = vector.broadcast %43 : vector<1x2xf32> to vector<2x2xf32>
    %45 = arith.addf %42, %44 : vector<2x2xf32>
    %cst_8 = arith.constant dense<0xFF800000> : vector<2xf32>
    %46 = vector.multi_reduction <maximumf>, %45, %cst_8 [0] : vector<2x2xf32> to vector<2xf32>
    %47 = vector.shape_cast %46 : vector<2xf32> to vector<1x2xf32>
    %48 = vector.broadcast %47 : vector<1x2xf32> to vector<2x2xf32>
    %49 = arith.subf %45, %48 : vector<2x2xf32>
    %50 = math.exp %49 : vector<2x2xf32>
    %cst_9 = arith.constant dense<0.000000e+00> : vector<2xf32>
    %51 = vector.multi_reduction <add>, %50, %cst_9 [0] : vector<2x2xf32> to vector<2xf32>
    %52 = vector.shape_cast %51 : vector<2xf32> to vector<1x2xf32>
    %53 = vector.broadcast %52 : vector<1x2xf32> to vector<2x2xf32>
    %54 = arith.divf %50, %53 : vector<2x2xf32>
    %c0_10 = arith.constant 0 : index
    %c0_11 = arith.constant 0 : index
    %c0_12 = arith.constant 0 : index
    %55 = vector.load %arg4[%c0_10, %c0_11, %c0_12] : memref<1x2x2xf32, #tpu.memory_space<vmem>>, vector<1x2x2xf32>
    %56 = vector.shape_cast %55 : vector<1x2x2xf32> to vector<2x2xf32>
    %57 = vector.shape_cast %54 : vector<2x2xf32> to vector<1x2x2xf32>
    tpu.vector_store %arg4[%c0_10, %c0_11, %c0_12], %57 {strides = array<i32>} : memref<1x2x2xf32, #tpu.memory_space<vmem>>, vector<1x2x2xf32>,
    return
  }
  func.func @transform_0(%arg0: i32) -> (i32, i32, i32) {
    %c0_i32 = arith.constant 0 : i32
    %c0_i32_0 = arith.constant 0 : i32
    %c0_i32_1 = arith.constant 0 : i32
    return %arg0, %c0_i32, %c0_i32_0 : i32, i32, i32
  }
  func.func @transform_1(%arg0: i32) -> (i32, i32) {
    %c0_i32 = arith.constant 0 : i32
    %c0_i32_0 = arith.constant 0 : i32
    %c0_i32_1 = arith.constant 0 : i32
    return %c0_i32, %c0_i32_0 : i32, i32
  }
  func.func @transform_2(%arg0: i32) -> (i32, i32) {
    %c0_i32 = arith.constant 0 : i32
    %c0_i32_0 = arith.constant 0 : i32
    %c0_i32_1 = arith.constant 0 : i32
    return %c0_i32, %c0_i32_0 : i32, i32
  }
  func.func @transform_3(%arg0: i32) -> (i32, i32, i32) {
    %c0_i32 = arith.constant 0 : i32
    %c0_i32_0 = arith.constant 0 : i32
    %c0_i32_1 = arith.constant 0 : i32
    return %arg0, %c0_i32, %c0_i32_0 : i32, i32, i32
  }
}

</mosaic_0001>

<bundles_post_ra>
// kernel: tpu_custom_call.1
= control target key start
LH: loop header
LB: loop body
LE: loop exit
PB: predicated region body
PF: predicated region fallthrough
CT: control target
= control target key end

     0   :  { %s364_s12 = smov 0   ;;  %s397_s0 = inlined_call_operand.vmem [shape: f32[8,2,4], index: 0, kind: input, shape index: {}]   ;;  %s398_s1 = inlined_call_operand.vmem [shape: f32[5,128], index: 1, kind: input, shape index: {}]   ;;  %s399_s2 = inlined_call_operand.vmem [shape: f32[3,128], index: 2, kind: input, shape index: {}]   ;;  %s400_s3 = inlined_call_operand.vmem [shape: f32[8,2,2], index: 3, kind: output, shape index: {}]  }
   0x1 LB: > { %s302_s13 = sadd.s32 4294967295, %s338_s12   ;;  %p306_p0 = scmp.ge.s32.totalorder %s338_s12, 1  ;;  %s338_s12 = sphi %s364_s12, %s13_s12  }
   0x2   : > { %p136_p1 = scmp.lt.s32.totalorder %s338_s12, 9 }
   0x4   : > { %p137_p2 = pnand %p306_p0, %p136_p1 }
   0x5   : > { %p158_p3 = scmp.lt.s32.totalorder (!%p137_p2), %s302_s13, 7 }
   0x6   : > { %140 = sbr.rel (%p137_p2) target bundleno = 336 (0x150), region = 32 }
   0xb   : > { %v340_v0 = vmov 0   ;;  %v341_v1 = vmov 2   ;;  %s402_s13 = smov (!%p158_p3, %s302_s13), 7  ;;  %v342_v3 = vmov 1   ;;  %v343_v4 = vmov 3  }
   0xc   : > { %323 = vset.pattern.permute.xlu0 %v340_v0  ;;  %325 = vset.pattern.permute.xlu1 %v341_v1  ;;  %s307_s14 = sshll.u32 %s402_s13, 1  ;;  %v167_v5 = vld [vmem:[%s398_s1] sm:$0x1f]  ;;  %vm202_vm0 = vcmask 1041408   ;;  %vm211_vm1 = vcmask 7168   ;;  %vm215_vm2 = vcmask 9216  }
   0xd   : > { %s161_s17 = scalar_lea.vmem %s397_s0, %s307_s14  ;;  %v174_v8 = vperm.slane %v167_v5, 0  ;;  %v176_v9 = vperm.slane %v167_v5, 4  ;;  %v182_v11 = vperm.slane %v167_v5, 1  ;;  %v189_v12 = vperm.slane %v167_v5, 2  ;;  %v168_v21 = vld [vmem:[%s399_s2] sm:$0x7]  ;;  %s165_s24 = scalar_lea.vmem %s400_s3, %s307_s14 }
   0xe   : > { %v166_v2 = vld [vmem:[%s161_s17] sm:$0x3]  ;;  %v196_v13 = vperm.slane %v167_v5, 3  ;;  %v200_v24 = vperm.slane %v168_v21, 0  ;;  %v206_v28 = vperm.slane %v168_v21, 1  ;;  %v213_v32 = vperm.slane %v168_v21, 2 }
   0xf   : > { %171 = vperm.xlu0 %323, %v166_v2   ;;  %186 = vperm.xlu1 %325, %v166_v2  }
  0x17   : > { %324 = vset.pattern.permute.xlu0 %v342_v3  ;;  %326 = vset.pattern.permute.xlu1 %v343_v4 }
  0x18   : > { %179 = vperm.xlu0 %324, %v166_v2   ;;  %193 = vperm.xlu1 %326, %v166_v2  }
  0x20   : > { %327 = vset.pattern.permute.xlu0 %v343_v4 }
  0x81   : > { %v172_v6 = vpop.permute.xlu0 %171  ;;  %v187_v7 = vpop.permute.xlu1 %186 }
  0x82   : > { %v175_v10 = vmul.f32 %v174_v8, %v172_v6  ;;  %v190_v18 = vmul.f32 %v189_v12, %v187_v7 }
  0x84   : > { %v177_v16 = vadd.f32 %v176_v9, %v175_v10 }
  0x8a   : > { %v180_v14 = vpop.permute.xlu0 %179  ;;  %v194_v15 = vpop.permute.xlu1 %193 }
  0x8b   : > { %v183_v17 = vmul.f32 %v182_v11, %v180_v14  ;;  %v197_v20 = vmul.f32 %v196_v13, %v194_v15 }
  0x8d   : > { %v184_v19 = vadd.f32 %v183_v17, %v177_v16 }
  0x8f   : > { %v191_v22 = vadd.f32 %v190_v18, %v184_v19 }
  0x91   : > { %v198_v23 = vadd.f32 %v197_v20, %v191_v22 }
  0x93   : > { %v199_v25 = vmax.f32 %v198_v23, 0.0 }
  0x95   : > { %v201_v26 = vmul.f32 %v200_v24, %v199_v25  ;;  %v207_v29 = vmul.f32 %v206_v28, %v199_v25 }
  0x97   : > { %v203_v27 = vsel %vm202_vm0, %v201_v26, 0.0  ;;  %v208_v30 = vsel %vm202_vm0, %v207_v29, 0.0 }
  0x98   : > { %204 = vadd.xlane.f32.xlu2 %v203_v27 }
  0xa0   : > { %209 = vadd.xlane.f32.xlu2 %v208_v30 }
 0x10b   : > { %v205_v31 = vpop.xlane.xlu2 %204 }
 0x113   : > { %v210_v33 = vpop.xlane.xlu2 %209 }
 0x114   : > { %v212_v34 = vsel %vm211_vm1, %v205_v31, %v210_v33 }
 0x115   : > { %v214_v35 = vadd.f32 %v213_v32, %v212_v34 }
 0x117   : > { %v216_v36 = vsel %vm215_vm2, %v214_v35, -inf }
 0x118   : > { %v217_v37 = vrot.slane %v216_v36, 4 }
 0x11a   : > { %v218_v38 = vmax.f32 %v216_v36, %v217_v37 }
 0x11c   : > { %v219_v39 = vrot.slane %v218_v38, 2 }
 0x11e   : > { %v220_v40 = vmax.f32 %v218_v38, %v219_v39 }
 0x120   : > { %v221_v41 = vrot.slane %v220_v40, 1 }
 0x122   : > { %v222_v42 = vmax.f32 %v220_v40, %v221_v41 }
 0x124   : > { %v223_v43 = vsub.f32 %v214_v35, %v222_v42 }
 0x126   : > { %v224_v44 = vmul.f32 1.442695, %v223_v43 }
 0x128   : > { %328 = vpow2.f32 %v224_v44 }
 0x12e   : > { %v329_v45 = vpop.eup %328 }
 0x12f   : > { %v226_v46 = vsel %vm215_vm2, %v329_v45, 0.0 }
 0x130   : > { %v227_v47 = vrot.slane %v226_v46, 4 }
 0x132   : > { %v228_v48 = vadd.f32 %v227_v47, %v226_v46 }
 0x134   : > { %v229_v49 = vrot.slane %v228_v48, 2 }
 0x136   : > { %v230_v50 = vadd.f32 %v229_v49, %v228_v48 }
 0x138   : > { %v231_v51 = vrot.slane %v230_v50, 1 }
 0x13a   : > { %v232_v52 = vadd.f32 %v231_v51, %v230_v50 }
 0x13c   : > { %330 = vrcp.f32 %v232_v52  ;;  %v244_v56 = vand.u32 2147483648, %v232_v52  ;;  %v242_v58 = vand.u32 2147483647, %v232_v52  ;;  %vm238_vm4 = vweird.f32 %v232_v52 }
 0x13e   : > { %v245_v60 = vor.u32 1.1754944e-38, %v244_v56  ;;  %vm243_vm6 = vcmp.eq.f32.partialorder %v242_v58, 8.507059e+37 }
 0x142   : > { %v331_v53 = vpop.eup %330 }
 0x143   : > { %v234_v54 = vmul.f32 %v331_v53, %v232_v52  ;;  %vm239_vm3 = vweird.f32 %v331_v53 }
 0x144   : > { %vm240_vm5 = vmor %vm238_vm4, %vm239_vm3 }
 0x145   : > { %v235_v55 = vsub.f32 1.0, %v234_v54 }
 0x147   : > { %v236_v57 = vmul.f32 %v331_v53, %v235_v55 }
 0x149   : > { %v237_v59 = vadd.f32 %v331_v53, %v236_v57 }
 0x14b   : > { %v241_v61 = vsel %vm240_vm5, %v331_v53, %v237_v59 }
 0x14c   : > { %v246_v62 = vsel %vm243_vm6, %v245_v60, %v241_v61 }
 0x14d   : > { %v247_v63 = vmul.f32 %v329_v45, %v246_v62 }
 0x14f   : > { %248 = vst.msk [vmem:[%s165_s24] sm:$0x3] %vm215_vm2, %v247_v63 }
 0x150 PF: > { %s13_s12 = sadd.s32 1, %s338_s12  }
 0x151   : > { %p10_p4 = scmp.ge.s32.totalorder %s13_s12, 10  }
 0x153   :  { %12 = sbr.rel (!%p10_p4) target bundleno = 1 (0x1), region = 62 }

</bundles_post_ra>
